<compile_context>
chip_gen: v7x
topology: tpu7x:2x2x1
jax: 0.10.0
libtpu: 0.0.40
codegen_flags: <defaults>
</compile_context>

<pallas_src>
import functools

import jax
import jax.numpy as jnp
from jax.experimental import pallas as pl
from jax.experimental.pallas import tpu as pltpu


def _sat_layer_kernel(x_ref, w_ref, a_ref, wt_ref, mask_ref, o_ref, *,
                      alpha, n_heads, f_out, apply_elu):
    """One SelfAttentionLayer, all heads fused, for one batch element.

    x_ref   : (1, N, F_in)     f32   current batch element
    w_ref   : (F_in, H*F_out)  bf16  all heads' projections, concat on lanes
    a_ref   : (H*F_out, 2*H)   bf16  block-diag attention vecs; col 2h -> a1_h,
                                     col 2h+1 -> a2_h
    wt_ref  : (1, N, N)        f32   weight_tensor for this batch element
    mask_ref: (N, N)           f32   1.0 inside |i-j|<=d_window band else 0.0
    o_ref   : (1, N, H*F_out)  f32   heads concatenated along the lane dim
    """
    x = x_ref[...][0]                                   # (N, F_in)
    wt = wt_ref[...][0]                                 # (N, N)
    band = mask_ref[...] > 0                            # (N, N) bool

    # h_all = x @ [W_0 | W_1 | ...]  — one lane-dense MXU matmul for all heads.
    h_all = jnp.dot(x.astype(jnp.bfloat16), w_ref[...],
                    preferred_element_type=jnp.float32)     # (N, H*F_out) f32

    # All per-head (h·a1, h·a2) projections in a single small MXU matmul
    # instead of 2*H cross-lane VPU/XLU reductions.
    fa = jnp.dot(h_all.astype(jnp.bfloat16), a_ref[...],
                 preferred_element_type=jnp.float32)         # (N, 2*H) f32

    neg_inf = jnp.float32(-1e12)
    outs = []
    for hd in range(n_heads):                           # static unroll (H small)
        f1 = fa[:, 2 * hd:2 * hd + 1]                   # (N, 1)
        f2 = fa[:, 2 * hd + 1:2 * hd + 2]               # (N, 1)
        e = f1 + jnp.transpose(f2)                      # (N, N)
        e = jnp.where(e >= 0, e, jnp.float32(alpha) * e)    # LeakyReLU
        e = e * wt                                      # elementwise weight
        e = jnp.where(band, e, neg_inf)                 # band adjacency mask

        # softmax over last axis (denominator reciprocal on the EUP)
        m = jnp.max(e, axis=-1, keepdims=True)
        p = jnp.exp(e - m)
        inv = pl.reciprocal(jnp.sum(p, axis=-1, keepdims=True), approx=True)
        attn = p * inv

        h_hd = h_all[:, hd * f_out:(hd + 1) * f_out]    # (N, F_out)
        hp = jnp.dot(attn.astype(jnp.bfloat16), h_hd.astype(jnp.bfloat16),
                     preferred_element_type=jnp.float32)
        if apply_elu:
            hp = jnp.where(hp > 0, hp, jnp.exp(jnp.minimum(hp, 0.0)) - 1.0)
        outs.append(hp)

    out = outs[0] if n_heads == 1 else jnp.concatenate(outs, axis=-1)
    o_ref[...] = out[None].astype(o_ref.dtype)          # single lane-dense store


def gat_layer(x, w_stack, a_stack, weight_tensor, band_mask, *, alpha,
              apply_elu):
    """One SelfAttentionLayer with all heads fused per grid step.

    x:             (B, N, F_in)   float32
    w_stack:       (H, F_in, F_out)
    a_stack:       (H, 2, F_out)
    weight_tensor: (B, N, N)
    band_mask:     (N, N) float32 in {0, 1}
    returns:       (B, N, H*F_out)  — heads already concatenated on lanes
    """
    b, n, f_in = x.shape
    h_heads, _, f_out = w_stack.shape
    f_tot = h_heads * f_out

    # Stack per-head projections along the output (lane) dim: (F_in, H*F_out).
    w_all = jnp.transpose(w_stack, (1, 0, 2)).reshape(f_in, f_tot)
    w_all = w_all.astype(jnp.bfloat16)
    # Block-diagonal attention-vector matrix (H*F_out, 2*H).
    eye = jnp.eye(h_heads, dtype=a_stack.dtype)
    a_mat = jnp.einsum("hcf,hg->hfgc", a_stack, eye).reshape(f_tot, 2 * h_heads)
    a_mat = a_mat.astype(jnp.bfloat16)

    kernel = functools.partial(_sat_layer_kernel, alpha=alpha,
                               n_heads=h_heads, f_out=f_out,
                               apply_elu=apply_elu)

    return pl.pallas_call(
        kernel,
        out_shape=jax.ShapeDtypeStruct((b, n, f_tot), jnp.float32),
        grid_spec=pltpu.PrefetchScalarGridSpec(
            num_scalar_prefetch=0,
            grid=(b,),
            in_specs=[
                pl.BlockSpec((1, n, f_in), lambda bi: (bi, 0, 0)),
                # constant index maps: W / a / band mask DMA'd once, stay
                # resident across grid steps (not refetched per batch).
                pl.BlockSpec((f_in, f_tot), lambda bi: (0, 0)),
                pl.BlockSpec((f_tot, 2 * h_heads), lambda bi: (0, 0)),
                pl.BlockSpec((1, n, n), lambda bi: (bi, 0, 0)),
                pl.BlockSpec((n, n), lambda bi: (0, 0)),
            ],
            out_specs=pl.BlockSpec((1, n, f_tot), lambda bi: (bi, 0, 0)),
        ),
        compiler_params=pltpu.CompilerParams(
            # batch axis is parallel (megacore / 2-TC sharding on v7x);
            # if B == 1 at deployment, split the node axis instead.
            dimension_semantics=("parallel",)),
    )(x, w_all, a_mat, weight_tensor, band_mask)


def sat_forward(x, weight_tensor, d_window, params, *, alpha):
    """SAT.forward (eval mode)."""
    n = x.shape[1]
    idx = jnp.arange(n)
    band_mask = (jnp.abs(idx[:, None] - idx[None, :]) <= d_window).astype(
        jnp.float32)

    # Multi-head attention, concat=True (ELU inside each head).  Heads land
    # pre-concatenated on the lane dim -> no transpose/reshape between calls.
    xh = gat_layer(x, params["W_heads"], params["a_heads"], weight_tensor,
                   band_mask, alpha=alpha, apply_elu=True)

    # out_att (concat=False) followed by SAT's outer F.elu == apply_elu=True.
    out = gat_layer(xh, params["W_out"][None], params["a_out"][None],
                    weight_tensor, band_mask, alpha=alpha, apply_elu=True)
    return out                                          # (B, N, n_class)


# ------------------------- pure-JAX reference ---------------------------- #
# Mirrors the kernel's bf16 MXU operands / f32 accumulation so the comparison
# isolates kernel-structure correctness (not bf16-vs-f32 quantization).
def _ref_layer(x, w, a, wt, alpha, d_window, apply_elu):
    bf = jnp.bfloat16
    h = jnp.einsum("bnf,fo->bno", x.astype(bf), w.astype(bf),
                   preferred_element_type=jnp.float32)
    f1 = jnp.einsum("bno,o->bn", h.astype(bf), a[0].astype(bf),
                    preferred_element_type=jnp.float32)
    f2 = jnp.einsum("bno,o->bn", h.astype(bf), a[1].astype(bf),
                    preferred_element_type=jnp.float32)
    e = f1[:, :, None] + f2[:, None, :]
    e = jnp.where(e >= 0, e, alpha * e)
    e = e * wt
    n = x.shape[1]
    adj = jnp.abs(jnp.arange(n)[:, None] - jnp.arange(n)[None, :]) <= d_window
    e = jnp.where(adj[None], e, -1e12)
    attn = jax.nn.softmax(e, axis=-1)
    hp = jnp.einsum("bij,bjo->bio", attn.astype(bf), h.astype(bf),
                    preferred_element_type=jnp.float32)
    if apply_elu:
        hp = jnp.where(hp > 0, hp, jnp.exp(jnp.minimum(hp, 0.0)) - 1.0)
    return hp


def _ref_sat(x, wt, d_window, params, alpha):
    heads = [_ref_layer(x, params["W_heads"][i], params["a_heads"][i], wt,
                        alpha, d_window, True)
             for i in range(params["W_heads"].shape[0])]
    xh = jnp.concatenate(heads, axis=2)
    return _ref_layer(xh, params["W_out"], params["a_out"], wt, alpha,
                      d_window, True)


# ------------------------------ params ------------------------------------ #
def _xavier_uniform(key, shape, gain):
    fan_in, fan_out = shape[-2], shape[-1]
    bound = gain * jnp.sqrt(6.0 / (fan_in + fan_out))
    return jax.random.uniform(key, shape, jnp.float32, -bound, bound)


def init_params(key, n_feat, n_hid, n_class, n_heads):
    gain = 1.414
    k = jax.random.split(key, 4)
    return {
        # per-head W: (in_features, out_features); a stored as (2, out_features)
        "W_heads": _xavier_uniform(k[0], (n_heads, n_feat, n_hid), gain),
        "a_heads": _xavier_uniform(k[1], (n_heads, 2, n_hid), gain),
        "W_out": _xavier_uniform(k[2], (n_hid * n_heads, n_class), gain),
        "a_out": _xavier_uniform(k[3], (2, n_class), gain),
    }


if __name__ == "__main__":
    B, N = 2, 8
    n_feat, n_hid, n_class, n_heads = 16, 16, 8, 2
    alpha = 0.2
    d_window = 2

    key = jax.random.PRNGKey(0)
    kx, kw, kp = jax.random.split(key, 3)
    x = jax.random.normal(kx, (B, N, n_feat), jnp.float32)
    weight_tensor = jax.random.uniform(kw, (B, N, N), jnp.float32, 0.5, 1.5)
    params = init_params(kp, n_feat, n_hid, n_class, n_heads)

    out = sat_forward(x, weight_tensor, d_window, params, alpha=alpha)
    out = jax.block_until_ready(out)

    ref = _ref_sat(x, weight_tensor, d_window, params, alpha)
    assert out.shape == (B, N, n_class)
    err = jnp.max(jnp.abs(out - ref))
    # tolerance covers pl.reciprocal(approx=True) + bf16 bin effects across
    # the two stacked layers (reference mirrors the bf16 MXU casts).
    assert jnp.allclose(out, ref, atol=3e-2, rtol=3e-2), f"max abs err {err}"

    print("KERNEL_OK")
</pallas_src>

<mosaic_0001>
module attributes {stable_mosaic.version = 11 : i64} {
  func.func @_sat_layer_kernel(%arg0: i32, %arg1: memref<1x8x16xf32, #tpu.memory_space<vmem>>, %arg2: memref<16x32xbf16, #tpu.memory_space<vmem>>, %arg3: memref<32x4xbf16, #tpu.memory_space<vmem>>, %arg4: memref<1x8x8xf32, #tpu.memory_space<vmem>>, %arg5: memref<8x8xf32, #tpu.memory_space<vmem>>, %arg6: memref<1x8x32xf32, #tpu.memory_space<vmem>>) attributes {dimension_semantics = [#tpu.dimension_semantics<parallel>], iteration_bounds = array<i64: 2>, scalar_prefetch = 0 : i64, scratch_operands = 0 : i64, tpu.core_type = #tpu.core_type<tc>, window_params = [{transform_indices = @transform_0, window_bounds = array<i64: 1, 8, 16>}, {pipeline_mode = #tpu.pipeline_mode<synchronous>, transform_indices = @transform_1, window_bounds = array<i64: 16, 32>}, {pipeline_mode = #tpu.pipeline_mode<synchronous>, transform_indices = @transform_2, window_bounds = array<i64: 32, 4>}, {transform_indices = @transform_3, window_bounds = array<i64: 1, 8, 8>}, {pipeline_mode = #tpu.pipeline_mode<synchronous>, transform_indices = @transform_4, window_bounds = array<i64: 8, 8>}, {transform_indices = @transform_5, window_bounds = array<i64: 1, 8, 32>}]} {
    %c0 = arith.constant 0 : index
    %c0_0 = arith.constant 0 : index
    %c0_1 = arith.constant 0 : index
    %0 = vector.load %arg1[%c0, %c0_0, %c0_1] : memref<1x8x16xf32, #tpu.memory_space<vmem>>, vector<1x8x16xf32>
    %1 = vector.shape_cast %0 : vector<1x8x16xf32> to vector<8x16xf32>
    %c0_2 = arith.constant 0 : index
    %c0_3 = arith.constant 0 : index
    %c0_4 = arith.constant 0 : index
    %2 = vector.load %arg4[%c0_2, %c0_3, %c0_4] : memref<1x8x8xf32, #tpu.memory_space<vmem>>, vector<1x8x8xf32>
    %3 = vector.shape_cast %2 : vector<1x8x8xf32> to vector<8x8xf32>
    %c0_5 = arith.constant 0 : index
    %c0_6 = arith.constant 0 : index
    %4 = vector.load %arg5[%c0_5, %c0_6] : memref<8x8xf32, #tpu.memory_space<vmem>>, vector<8x8xf32>
    %cst = arith.constant 0.000000e+00 : f32
    %5 = vector.broadcast %cst : f32 to vector<8x8xf32>
    %6 = arith.cmpf ogt, %4, %5 : vector<8x8xf32>
    %7 = arith.truncf %1 : vector<8x16xf32> to vector<8x16xbf16>
    %c0_7 = arith.constant 0 : index
    %c0_8 = arith.constant 0 : index
    %8 = vector.load %arg2[%c0_7, %c0_8] : memref<16x32xbf16, #tpu.memory_space<vmem>>, vector<16x32xbf16>
    %cst_9 = arith.constant dense<0.000000e+00> : vector<8x32xf32>
    %9 = tpu.matmul %7, %8, %cst_9 {dimension_numbers = #tpu.dot_dimension_numbers<[1], [0], [0], [1], [0, 0, 1, 1], [], []>} : vector<8x16xbf16>, vector<16x32xbf16>, vector<8x32xf32> -> vector<8x32xf32>
    %10 = arith.truncf %9 : vector<8x32xf32> to vector<8x32xbf16>
    %c0_10 = arith.constant 0 : index
    %c0_11 = arith.constant 0 : index
    %11 = vector.load %arg3[%c0_10, %c0_11] : memref<32x4xbf16, #tpu.memory_space<vmem>>, vector<32x4xbf16>
    %cst_12 = arith.constant dense<0.000000e+00> : vector<8x4xf32>
    %12 = tpu.matmul %10, %11, %cst_12 {dimension_numbers = #tpu.dot_dimension_numbers<[1], [0], [0], [1], [0, 0, 1, 1], [], []>} : vector<8x32xbf16>, vector<32x4xbf16>, vector<8x4xf32> -> vector<8x4xf32>
    %13 = vector.extract_strided_slice %12 {offsets = [0, 0], sizes = [8, 1], strides = [1, 1]} : vector<8x4xf32> to vector<8x1xf32>
    %14 = vector.extract_strided_slice %12 {offsets = [0, 1], sizes = [8, 1], strides = [1, 1]} : vector<8x4xf32> to vector<8x1xf32>
    %15 = tpu.transpose %14, [1, 0] : vector<8x1xf32> -> vector<1x8xf32>
    %16 = vector.broadcast %13 : vector<8x1xf32> to vector<8x8xf32>
    %17 = vector.broadcast %15 : vector<1x8xf32> to vector<8x8xf32>
    %18 = arith.addf %16, %17 : vector<8x8xf32>
    %cst_13 = arith.constant 0.000000e+00 : f32
    %19 = vector.broadcast %cst_13 : f32 to vector<8x8xf32>
    %20 = arith.cmpf oge, %18, %19 : vector<8x8xf32>
    %cst_14 = arith.constant 2.000000e-01 : f32
    %21 = vector.broadcast %cst_14 : f32 to vector<8x8xf32>
    %22 = arith.mulf %21, %18 : vector<8x8xf32>
    %23 = arith.select %20, %18, %22 : vector<8x8xi1>, vector<8x8xf32>
    %24 = arith.mulf %23, %3 : vector<8x8xf32>
    %cst_15 = arith.constant -9.99999995E+11 : f32
    %25 = vector.broadcast %cst_15 : f32 to vector<8x8xf32>
    %26 = arith.select %6, %24, %25 : vector<8x8xi1>, vector<8x8xf32>
    %cst_16 = arith.constant dense<0xFF800000> : vector<8xf32>
    %27 = vector.multi_reduction <maximumf>, %26, %cst_16 [1] : vector<8x8xf32> to vector<8xf32>
    %28 = vector.shape_cast %27 : vector<8xf32> to vector<8x1xf32>
    %29 = vector.broadcast %28 : vector<8x1xf32> to vector<8x8xf32>
    %30 = arith.subf %26, %29 : vector<8x8xf32>
    %31 = math.exp %30 : vector<8x8xf32>
    %cst_17 = arith.constant dense<0.000000e+00> : vector<8xf32>
    %32 = vector.multi_reduction <add>, %31, %cst_17 [1] : vector<8x8xf32> to vector<8xf32>
    %33 = vector.shape_cast %32 : vector<8xf32> to vector<8x1xf32>
    %34 = tpu.reciprocal %33 {approx = true} : vector<8x1xf32> -> vector<8x1xf32>
    %35 = vector.broadcast %34 : vector<8x1xf32> to vector<8x8xf32>
    %36 = arith.mulf %31, %35 : vector<8x8xf32>
    %37 = vector.extract_strided_slice %9 {offsets = [0, 0], sizes = [8, 16], strides = [1, 1]} : vector<8x32xf32> to vector<8x16xf32>
    %38 = arith.truncf %36 : vector<8x8xf32> to vector<8x8xbf16>
    %39 = arith.truncf %37 : vector<8x16xf32> to vector<8x16xbf16>
    %cst_18 = arith.constant dense<0.000000e+00> : vector<8x16xf32>
    %40 = tpu.matmul %38, %39, %cst_18 {dimension_numbers = #tpu.dot_dimension_numbers<[1], [0], [0], [1], [0, 0, 1, 1], [], []>} : vector<8x8xbf16>, vector<8x16xbf16>, vector<8x16xf32> -> vector<8x16xf32>
    %cst_19 = arith.constant 0.000000e+00 : f32
    %41 = vector.broadcast %cst_19 : f32 to vector<8x16xf32>
    %42 = arith.cmpf ogt, %40, %41 : vector<8x16xf32>
    %cst_20 = arith.constant 0.000000e+00 : f32
    %43 = vector.broadcast %cst_20 : f32 to vector<8x16xf32>
    %44 = arith.minimumf %40, %43 : vector<8x16xf32>
    %45 = math.exp %44 : vector<8x16xf32>
    %cst_21 = arith.constant 1.000000e+00 : f32
    %46 = vector.broadcast %cst_21 : f32 to vector<8x16xf32>
    %47 = arith.subf %45, %46 : vector<8x16xf32>
    %48 = arith.select %42, %40, %47 : vector<8x16xi1>, vector<8x16xf32>
    %49 = vector.extract_strided_slice %12 {offsets = [0, 2], sizes = [8, 1], strides = [1, 1]} : vector<8x4xf32> to vector<8x1xf32>
    %50 = vector.extract_strided_slice %12 {offsets = [0, 3], sizes = [8, 1], strides = [1, 1]} : vector<8x4xf32> to vector<8x1xf32>
    %51 = tpu.transpose %50, [1, 0] : vector<8x1xf32> -> vector<1x8xf32>
    %52 = vector.broadcast %49 : vector<8x1xf32> to vector<8x8xf32>
    %53 = vector.broadcast %51 : vector<1x8xf32> to vector<8x8xf32>
    %54 = arith.addf %52, %53 : vector<8x8xf32>
    %cst_22 = arith.constant 0.000000e+00 : f32
    %55 = vector.broadcast %cst_22 : f32 to vector<8x8xf32>
    %56 = arith.cmpf oge, %54, %55 : vector<8x8xf32>
    %cst_23 = arith.constant 2.000000e-01 : f32
    %57 = vector.broadcast %cst_23 : f32 to vector<8x8xf32>
    %58 = arith.mulf %57, %54 : vector<8x8xf32>
    %59 = arith.select %56, %54, %58 : vector<8x8xi1>, vector<8x8xf32>
    %60 = arith.mulf %59, %3 : vector<8x8xf32>
    %cst_24 = arith.constant -9.99999995E+11 : f32
    %61 = vector.broadcast %cst_24 : f32 to vector<8x8xf32>
    %62 = arith.select %6, %60, %61 : vector<8x8xi1>, vector<8x8xf32>
    %cst_25 = arith.constant dense<0xFF800000> : vector<8xf32>
    %63 = vector.multi_reduction <maximumf>, %62, %cst_25 [1] : vector<8x8xf32> to vector<8xf32>
    %64 = vector.shape_cast %63 : vector<8xf32> to vector<8x1xf32>
    %65 = vector.broadcast %64 : vector<8x1xf32> to vector<8x8xf32>
    %66 = arith.subf %62, %65 : vector<8x8xf32>
    %67 = math.exp %66 : vector<8x8xf32>
    %cst_26 = arith.constant dense<0.000000e+00> : vector<8xf32>
    %68 = vector.multi_reduction <add>, %67, %cst_26 [1] : vector<8x8xf32> to vector<8xf32>
    %69 = vector.shape_cast %68 : vector<8xf32> to vector<8x1xf32>
    %70 = tpu.reciprocal %69 {approx = true} : vector<8x1xf32> -> vector<8x1xf32>
    %71 = vector.broadcast %70 : vector<8x1xf32> to vector<8x8xf32>
    %72 = arith.mulf %67, %71 : vector<8x8xf32>
    %73 = vector.extract_strided_slice %9 {offsets = [0, 16], sizes = [8, 16], strides = [1, 1]} : vector<8x32xf32> to vector<8x16xf32>
    %74 = arith.truncf %72 : vector<8x8xf32> to vector<8x8xbf16>
    %75 = arith.truncf %73 : vector<8x16xf32> to vector<8x16xbf16>
    %cst_27 = arith.constant dense<0.000000e+00> : vector<8x16xf32>
    %76 = tpu.matmul %74, %75, %cst_27 {dimension_numbers = #tpu.dot_dimension_numbers<[1], [0], [0], [1], [0, 0, 1, 1], [], []>} : vector<8x8xbf16>, vector<8x16xbf16>, vector<8x16xf32> -> vector<8x16xf32>
    %cst_28 = arith.constant 0.000000e+00 : f32
    %77 = vector.broadcast %cst_28 : f32 to vector<8x16xf32>
    %78 = arith.cmpf ogt, %76, %77 : vector<8x16xf32>
    %cst_29 = arith.constant 0.000000e+00 : f32
    %79 = vector.broadcast %cst_29 : f32 to vector<8x16xf32>
    %80 = arith.minimumf %76, %79 : vector<8x16xf32>
    %81 = math.exp %80 : vector<8x16xf32>
    %cst_30 = arith.constant 1.000000e+00 : f32
    %82 = vector.broadcast %cst_30 : f32 to vector<8x16xf32>
    %83 = arith.subf %81, %82 : vector<8x16xf32>
    %84 = arith.select %78, %76, %83 : vector<8x16xi1>, vector<8x16xf32>
    %85 = tpu.concatenate %48, %84 in 1 : vector<8x16xf32>, vector<8x16xf32> -> vector<8x32xf32>
    %86 = vector.shape_cast %85 : vector<8x32xf32> to vector<1x8x32xf32>
    %c0_31 = arith.constant 0 : index
    %c0_32 = arith.constant 0 : index
    %c0_33 = arith.constant 0 : index
    %87 = vector.load %arg6[%c0_31, %c0_32, %c0_33] : memref<1x8x32xf32, #tpu.memory_space<vmem>>, vector<1x8x32xf32>
    tpu.vector_store %arg6[%c0_31, %c0_32, %c0_33], %86 {strides = array<i32>} : memref<1x8x32xf32, #tpu.memory_space<vmem>>, vector<1x8x32xf32>,
    return
  }
  func.func @transform_0(%arg0: i32) -> (i32, i32, i32) {
    %c0_i32 = arith.constant 0 : i32
    %c0_i32_0 = arith.constant 0 : i32
    %c0_i32_1 = arith.constant 0 : i32
    return %arg0, %c0_i32, %c0_i32_0 : i32, i32, i32
  }
  func.func @transform_1(%arg0: i32) -> (i32, i32) {
    %c0_i32 = arith.constant 0 : i32
    %c0_i32_0 = arith.constant 0 : i32
    %c0_i32_1 = arith.constant 0 : i32
    return %c0_i32, %c0_i32_0 : i32, i32
  }
  func.func @transform_2(%arg0: i32) -> (i32, i32) {
    %c0_i32 = arith.constant 0 : i32
    %c0_i32_0 = arith.constant 0 : i32
    %c0_i32_1 = arith.constant 0 : i32
    return %c0_i32, %c0_i32_0 : i32, i32
  }
  func.func @transform_3(%arg0: i32) -> (i32, i32, i32) {
    %c0_i32 = arith.constant 0 : i32
    %c0_i32_0 = arith.constant 0 : i32
    %c0_i32_1 = arith.constant 0 : i32
    return %arg0, %c0_i32, %c0_i32_0 : i32, i32, i32
  }
  func.func @transform_4(%arg0: i32) -> (i32, i32) {
    %c0_i32 = arith.constant 0 : i32
    %c0_i32_0 = arith.constant 0 : i32
    %c0_i32_1 = arith.constant 0 : i32
    return %c0_i32, %c0_i32_0 : i32, i32
  }
  func.func @transform_5(%arg0: i32) -> (i32, i32, i32) {
    %c0_i32 = arith.constant 0 : i32
    %c0_i32_0 = arith.constant 0 : i32
    %c0_i32_1 = arith.constant 0 : i32
    return %arg0, %c0_i32, %c0_i32_0 : i32, i32, i32
  }
}

</mosaic_0001>

<bundles_post_ra>
// kernel: tpu_custom_call.1
= control target key start
LH: loop header
LB: loop body
LE: loop exit
PB: predicated region body
PF: predicated region fallthrough
CT: control target
= control target key end

     0   :  { %10 = vsyncpa [#allocation3], 0  ;;  %s1291_s0 = inlined_call_operand.vmem [shape: f32[2,8,16], index: 0, kind: input, shape index: {}]   ;;  %s1292_s1 = inlined_call_operand.hbm [shape: bf16[16,32], index: 1, kind: input, shape index: {}]   ;;  %s1293_s2 = inlined_call_operand.vmem [shape: bf16[32,4], index: 2, kind: input, shape index: {}]   ;;  %s1294_s3 = inlined_call_operand.hbm [shape: f32[2,8,8], index: 3, kind: input, shape index: {}]   ;;  %s1295_s4 = inlined_call_operand.vmem [shape: f32[8,8], index: 4, kind: input, shape index: {}]   ;;  %s1296_s5 = inlined_call_operand.hbm [shape: f32[2,8,32], index: 5, kind: output, shape index: {}]  }
   0x1   :  { %11 = vsyncpa [#allocation6], 0 }
   0x2   :  { %13 = vsyncpa [#allocation6 + $0x1], 0 }
   0x3   :  { %14 = vsyncpa [#allocation4], 0 }
   0x4   :  { %16 = vsyncpa [#allocation4 + $0x1], 0  ;;  %s1053_s18 = smov 0   ;;  %s1055_s19 = smov 0  }
   0x5   :  { %s1057_s20 = smov 0   ;;  %s1059_s21 = smov 0  }
   0x6 LB: > { %s1074_s22 = sadd.s32 4294967295, %s1008_s21   ;;  %s736_s23 = sadd.s32 4294967294, %s1008_s21   ;;  %s1008_s21 = sphi %s1059_s21, %s1316_s21   ;;  %s1004_s20 = sphi %s1057_s20, %s1315_s20   ;;  %s1000_s19 = sphi %s1055_s19, %s1314_s19   ;;  %s996_s18 = sphi %s1053_s18, %s1313_s18  }
   0x7   : > { %p110_p0 = scmp.ne.s32.totalorder %s1000_s19, %s996_s18  ;;  %p1297_p1 = scmp.eq.s32.totalorder %s1074_s22, 0 }
   0x8   : > { %p161_p3 = scmp.eq.s32.totalorder %s736_s23, 1  ;;  %p737_p5 = scmp.ge.s32.totalorder %s1008_s21, 1 }
   0x9   : > { %p1083_p4 = por %p1297_p1, %p110_p0  ;;  %p168_p7 = scmp.lt.s32.totalorder %s1008_s21, 3 }
   0xa   : > { %p1088_p6 = por %p161_p3, %p110_p0  ;;  %s1010_s27 = smov [#allocation2]  }
   0xb   : > { %s1300_s24 = scalar_select %p1083_p4, 1, 0 }
   0xc   : > { %s1301_s25 = scalar_select %p1088_p6, 1, 0 }
   0xd   : > { %p1093_p8 = pnand %p737_p5, %p168_p7  ;;  %s180_s28 = sshll.u32 %s1010_s27, 4  ;;  %s1097_s28 = int_to_ptr.vmem [resolvable:$true] %s180_s28 }
   0xe   : > { %s1109_s30 = sadd.s32 1, %s1008_s21   ;;  %s97_s6 = sadd.s32 1, %s1004_s20 }
   0xf   : > { %s1302_s26 = scalar_select %p1093_p8, 1, 0 }
  0x10   : > { %p803_p9 = pneg %p1093_p8  ;;  %s94_s7 = ssub.s32 %s1008_s21, %s1109_s30 }
  0x11   : > { %s880_s10 = scalar_lea.hbm %s1292_s1, 128 }
  0x12   : > { %p1104_p11 = pnand %p803_p9, %p1297_p1  ;;  %p881_p12 = scmp.ne.s32.totalorder %s1292_s1, %s880_s10 }
  0x13   : > { %p887_p5 = scmp.lt.u32.totalorder %s880_s10, %s1292_s1 }
  0x14   : > { %p882_p13 = pneg %p1104_p11 }
  0x16   : > { %p883_p0 = pnand %p882_p13, %p881_p12 }
  0x18   : > { %p884_p3 = pneg %p883_p0 }
  0x1a   : > { %p889_p7 = pnand %p887_p5, %p884_p3 }
  0x1c   : > { %892 = shalt.err (!%p889_p7)
}
  0x1d   : > { %s893_s15 = scalar_lea.vmem %s1097_s28, 128  ;;  %p901_p2 = scmp.lt.s32.totalorder %s1097_s28, %s1097_s28 }
  0x1e   : > { %p894_p9 = scmp.ne.s32.totalorder %s1097_s28, %s893_s15  ;;  %p902_p6 = scmp.lt.s32.totalorder %s893_s15, %s893_s15 }
  0x20   : > { %p896_p10 = pnand %p894_p9, %p882_p13  ;;  %p903_p4 = por %p902_p6, %p901_p2 }
  0x22   : > { %p897_p1 = pneg %p896_p10 }
  0x24   : > { %p904_p8 = pnand %p903_p4, %p897_p1 }
  0x26   : > { %907 = shalt.err (!%p904_p8)
}
  0x27   : > { %s1011_s16 = smov 64   ;;  %s1012_s17 = smov 4  }
  0x28   : > { %806 = dma.hbm_to_vmem [thread:$0]  (!%p1104_p11), %s1292_s1, 128, %s1097_s28, [#allocation3], %s1011_s16, %s1011_s16, %s1012_s17  }
  0x29   : > { %p95_p2 = scmp.eq.s32.totalorder %s94_s7, 0  ;;  %p104_p1 = scmp.ne.s32.totalorder %s1004_s20, %s1000_s19 }
  0x2a   : > { %p105_p4 = scmp.eq.s32.totalorder %s1008_s21, 0  ;;  %p816_p6 = scmp.lt.s32.totalorder %s1008_s21, 2 }
  0x2b   : > { %s1140_s8 = scalar_select %p95_p2, %s1004_s20, %s97_s6  }
  0x2c   : > { %p106_p8 = por %p105_p4, %p104_p1  ;;  %p1304_p10 = scmp.eq.s32.totalorder %s1074_s22, 1 }
  0x2d   : > { %s207_s10 = sand.u32 1, %s1004_s20   ;;  %s741_s11 = sshll.u32 %s1008_s21, 7 }
  0x2e   : > { %p1144_p12 = por %p1304_p10, %p104_p1  ;;  %s740_s12 = sshll.u32 %s207_s10, 3 }
  0x2f   : > { %s1153_s14 = scalar_lea.hbm %s1294_s3, %s741_s11  ;;  %s211_s28 = scalar_lea.vmem [#allocation5], %s740_s12 }
  0x30   : > { %s218_s6 = sshll.u32 %s211_s28, 4  ;;  %p1155_p11 = pnand %p816_p6, %p106_p8  ;;  %s1159_s6 = int_to_ptr.vmem [resolvable:$true] %s218_s6 }
  0x31   : > { %s208_s15 = scalar_lea.sflag [#allocation6], %s207_s10  ;;  %s908_s16 = scalar_lea.hbm %s1153_s14, 128 }
  0x32   : > { %p909_p13 = scmp.ne.s32.totalorder %s1153_s14, %s908_s16  ;;  %p910_p0 = pneg %p1155_p11 }
  0x33   : > { %s913_s27 = scalar_lea.hbm %s1294_s3, 256  ;;  %p914_p7 = scmp.lt.u32.totalorder %s1153_s14, %s1294_s3 }
  0x34   : > { %p911_p3 = pnand %p910_p0, %p909_p13  ;;  %p915_p9 = scmp.lt.u32.totalorder %s913_s27, %s908_s16 }
  0x35   : > { %p917_p1 = scmp.lt.u32.totalorder %s908_s16, %s1153_s14 }
  0x36   : > { %p912_p5 = pneg %p911_p3  ;;  %p916_p2 = por %p915_p9, %p914_p7 }
  0x38   : > { %p918_p4 = por %p917_p1, %p916_p2 }
  0x3a   : > { %p919_p6 = pnand %p918_p4, %p912_p5 }
  0x3c   : > { %922 = shalt.err (!%p919_p6)
}
  0x3d   : > { %s923_s10 = scalar_lea.vmem %s1159_s6, 128  ;;  %s1013_s29 = smov [#allocation5]  }
  0x3e   : > { %p924_p8 = scmp.ne.s32.totalorder %s1159_s6, %s923_s10  ;;  %s928_s13 = sshll.u32 %s1013_s29, 4  ;;  %s929_s13 = int_to_ptr.vmem [resolvable:$false] %s928_s13 }
  0x3f   : > { %s930_s28 = scalar_lea.vmem %s929_s13, 256  ;;  %p931_p3 = scmp.lt.s32.totalorder %s1159_s6, %s929_s13 }
  0x40   : > { %p926_p10 = pnand %p924_p8, %p910_p0  ;;  %p932_p7 = scmp.lt.s32.totalorder %s930_s28, %s923_s10 }
  0x42   : > { %p927_p13 = pneg %p926_p10  ;;  %p933_p9 = por %p932_p7, %p931_p3 }
  0x44   : > { %p934_p2 = pnand %p933_p9, %p927_p13 }
  0x46   : > { %937 = shalt.err (!%p934_p2)
}
  0x47   : > { %810 = dma.hbm_to_vmem [thread:$0]  (!%p1155_p11), %s1153_s14, 128, %s1159_s6, %s208_s15  }
  0x48   : > { %p1307_p5 = scmp.ne.s32.totalorder %s1302_s26, 0 }
  0x49   : > { %p1308_p0 = scmp.eq.s32.totalorder (!%p1307_p5), %s1074_s22, 0 }
  0x4a   : > { %227 = sbr.rel (%p1307_p5) target bundleno = 1451 (0x5ab), region = 40 }
  0x51   : > { %983 = dma.done.wait (%p1308_p0), [#allocation3], 128   ;;  %p1309_p1 = pmov %p1308_p0 }
  0x52   : > { %s1193_s16 = sand.u32 1, %s1000_s19   ;;  %p1310_p11 = scmp.ne.s32.totalorder %s1300_s24, 0 }
  0x53   : > { %985 = vsyncadd (%p1309_p1), [#allocation3], 4294967168  ;;  %s744_s7 = sshll.u32 %s1193_s16, 3  ;;  %s234_s17 = scalar_lea.sflag [#allocation6], %s1193_s16 }
  0x54   : > { %s1199_s14 = scalar_lea.vmem [#allocation5], %s744_s7 }
  0x55   : > { %987 = dma.done.wait (%p1310_p11), %s234_s17, 128  }
  0x56   : > { %989 = vsyncadd (%p1310_p11), %s234_s17, 4294967168  ;;  %p268_p4 = scmp.lt.s32.totalorder %s1074_s22, 1  ;;  %v1014_v0 = vmov 0.0   ;;  %vm1015_vm0 = vmmov 0   ;;  %v865_v1 = vld [vmem:[#allocation2] sm:$0xff]   ;;  %vm286_vm1 = vcmask 130048   ;;  %v431_v20 = vlaneseq }
  0x57   : > { %769 = vmatprep.subr.bf16.mxu0 %v1014_v0  ;;  %771 = vmatprep.mubr.msk.bf16.mxu0 %vm1015_vm0, %v1014_v0  ;;  %v866_v4 = vld [vmem:[%s1293_s2] sm:$0xff]   ;;  %v867_v5 = vld [vmem:[%s1293_s2 + $0x8] sm:$0xff]   ;;  %vm347_vm2 = vcmask 261120   ;;  %vm457_vm3 = vcmask 1043456   ;;  %v1016_v12 = vmov 2   ;;  %s1017_s29 = smov 127  }
  0x58   : > { %s269_s26 = scalar_select %p268_p4, %s1074_s22, 1  ;;  %775 = vmatprep.subr.bf16.mxu1 %v1014_v0  ;;  %779 = vmatprep.mubr.msk.bf16.mxu1 %vm1015_vm0, %v1014_v0  ;;  %v1019_v17 = vmov 0   ;;  %v432_v21 = vshrl.u32 %v431_v20, 7  ;;  %v275_v28 = vld [vmem:[%s1295_s4] sm:$0xff]  ;;  %v274_v31 = vld [vmem:[%s1199_s14] sm:$0xff]  ;;  %vm441_vm6 = vcmask 64512  }
  0x59   : > { %770 = vmatpush3.bf16.msra.mxu0 %v865_v1  ;;  %776 = vmatpush3.bf16.msra.mxu1 %v866_v4  ;;  %s1018_s13 = smov 125   ;;  %vm276_vm5 = vcmp.gt.f32.partialorder %v275_v28, 0.0  ;;  %s1020_s14 = smov 112  }
  0x5a   : > { %s746_s6 = sshll.u32 %s269_s26, 3  ;;  %783 = vmatprep.subr.bf16.mxu0 %v1014_v0  ;;  %777 = vmatprep.subr.bf16.mxu1 %v1014_v0  ;;  %v433_v22 = vsub.s32 0, %v432_v21  ;;  %s1021_s26 = smov 16  }
  0x5b   : > { %s271_s27 = scalar_lea.vmem %s1291_s0, %s746_s6  ;;  %862 = vset.pattern.permute.xlu0 %v1016_v12  ;;  %s757_s6 = sshll.u32 %s1074_s22, 7 }
  0x5c   : > { %v273_v2 = vld [vmem:[%s271_s27] sm:$0xff]  ;;  %s267_s15 = scalar_lea.vmem [#allocation7], %s744_s7  ;;  %s1245_s11 = scalar_lea.hbm %s1296_s5, %s757_s6 }
  0x5d   : > { %v277_v3 = vpack.c.bf16 %v273_v2, %v273_v2  ;;  %778 = vmatpush3.bf16.msra.mxu1 %v867_v5  ;;  %s642_s23 = sshll.u32 %s267_s15, 4  ;;  %s629_s22 = scalar_lea.sflag [#allocation4], %s1193_s16  ;;  %s1247_s23 = int_to_ptr.vmem [resolvable:$true] %s642_s23 }
  0x5e   : > { %789 = vmatprep.subr.bf16.mxu1 %v1014_v0  ;;  %s938_s7 = scalar_lea.vmem %s1247_s23, 128  ;;  %s1022_s12 = smov [#allocation7]  }
  0x5f   : > { %772 = vmatmul.mubr.msk.bf16.vlgmr.msra.gmra.mrb[0].mxu0 %vm286_vm1, %v277_v3  ;;  %p939_p6 = scmp.ne.s32.totalorder %s1247_s23, %s938_s7  ;;  %s942_s10 = sshll.u32 %s1022_s12, 4  ;;  %s943_s10 = int_to_ptr.vmem [resolvable:$false] %s942_s10 }
  0x60   : > { %785 = vmatprep.mubr.msk.bf16.mxu0 %vm1015_vm0, %v1014_v0  ;;  %p945_p13 = scmp.lt.s32.totalorder %s1247_s23, %s943_s10 }
  0x61   : > { %p940_p8 = pnand %p939_p6, %p1144_p12 }
  0x63   : > { %p941_p10 = pneg %p940_p8 }
 0x132   : > { %v324_v6 = vpop.f32.mrb[0].mxu0 }
 0x133   : > { %v1220_v7 = vpack.c.bf16 %v324_v6, %v324_v6  ;;  %v773_v8 = vpop.f32.mrb[1].mxu0 }
 0x134   : > { %v327_v9 = vpop.f32.mrb[2].mxu0 }
 0x135   : > { %v774_v10 = vpop.f32.mrb[3].mxu0  ;;  %780 = vmatmul.mubr.msk.bf16.vlgmr.msra.gmra.mrb[0].mxu1 %vm347_vm2, %v1220_v7  ;;  %v458_v11 = vsel %vm457_vm3, %v1220_v7, 0 }
 0x136   : > { %784 = vmatpush3.bf16.msra.mxu0 %v458_v11  ;;  %791 = vmatprep.mubr.msk.bf16.mxu1 %vm1015_vm0, %v1014_v0 }
 0x208   : > { %v385_v13 = vpop.f32.mrb[0].mxu1 }
 0x209   : > { %392 = vrot.lane.b32.xlu1 %v385_v13, %s1017_s29  ;;  %506 = vrot.lane.b32.xlu0 %v385_v13, %s1018_s13  ;;  %v781_v14 = vpop.f32.mrb[1].mxu1  ;;  %s944_s29 = scalar_lea.vmem %s943_s10, 256 }
 0x20a   : > { %v388_v15 = vpop.f32.mrb[2].mxu1  ;;  %p946_p3 = scmp.lt.s32.totalorder %s944_s29, %s938_s7 }
 0x20b   : > { %v782_v16 = vpop.f32.mrb[3].mxu1 }
 0x20c   : > { %p947_p7 = por %p946_p3, %p945_p13 }
 0x20d   : > { %542 = vperm.xlu0 %862, %v385_v13  }
 0x20e   : > { %p948_p9 = pnand %p947_p7, %p941_p10 }
 0x211   : > { %863 = vset.pattern.permute.xlu0 %v1019_v17 }
 0x212   : > { %428 = vperm.xlu0 %863, %v385_v13  }
 0x216   : > { %864 = vset.pattern.permute.xlu0 %v1016_v12 }
 0x27b   : > { %v507_v18 = vpop.permute.xlu0 %506  ;;  %v393_v19 = vpop.permute.xlu1 %392 }
 0x27c   : > { %509 = vxpose.xlu1.b32.start.end [1/1] (short) (narrow) %v507_v18, 8 }
 0x280   : > { %395 = vxpose.xlu1.b32.start.end [1/1] (short) (narrow) %v393_v19, 8 }
 0x28c   : > { %v543_v23 = vpop.permute.xlu0 %542 }
 0x291   : > { %v429_v32 = vpop.permute.xlu0 %428 }
 0x2fc   : > { %v525_v24 = vpop.trf.xlu1 }
 0x2fd   : > { %v548_v25 = vrot.slane %v525_v24, %v433_v22 }
 0x2ff   : > { %v549_v26 = vadd.f32 %v548_v25, %v543_v23 }
 0x300   : > { %v411_v27 = vpop.trf.xlu1 }
 0x301   : > { %v551_v29 = vmul.f32 0.2, %v549_v26  ;;  %v434_v30 = vrot.slane %v411_v27, %v433_v22  ;;  %vm550_vm4 = vcmp.ge.f32.partialorder %v549_v26, 0.0 }
 0x303   : > { %v435_v33 = vadd.f32 %v434_v30, %v429_v32  ;;  %v552_v34 = vsel %vm550_vm4, %v549_v26, %v551_v29 }
 0x304   : > { %v553_v35 = vmul.f32 %v552_v34, %v274_v31 }
 0x305   : > { %v437_v36 = vmul.f32 0.2, %v435_v33  ;;  %vm436_vm7 = vcmp.ge.f32.partialorder %v435_v33, 0.0 }
 0x306   : > { %v554_v37 = vsel %vm276_vm5, %v553_v35, -1e+12 }
 0x307   : > { %v555_v38 = vsel %vm441_vm6, %v554_v37, -inf  ;;  %v438_v39 = vsel %vm436_vm7, %v435_v33, %v437_v36 }
 0x308   : > { %556 = vmax.xlane.f32.xlu0 %v555_v38  ;;  %v439_v40 = vmul.f32 %v438_v39, %v274_v31 }
 0x30a   : > { %v440_v41 = vsel %vm276_vm5, %v439_v40, -1e+12 }
 0x30b   : > { %v442_v42 = vsel %vm441_vm6, %v440_v41, -inf }
 0x30c   : > { %443 = vmax.xlane.f32.xlu1 %v442_v42 }
 0x395   : > { %v557_v43 = vpop.xlane.xlu0 %556 }
 0x396   : > { %v558_v44 = vsub.f32 %v554_v37, %v557_v43 }
 0x398   : > { %v559_v45 = vmul.f32 1.442695, %v558_v44 }
 0x399   : > { %v444_v48 = vpop.xlane.xlu1 %443 }
 0x39a   : > { %868 = vpow2.f32 %v559_v45  ;;  %v445_v49 = vsub.f32 %v440_v41, %v444_v48 }
 0x39c   : > { %v446_v50 = vmul.f32 1.442695, %v445_v49 }
 0x39e   : > { %870 = vpow2.f32 %v446_v50 }
 0x3a4   : > { %v869_v46 = vpop.eup %868 }
 0x3a5   : > { %v561_v47 = vsel %vm441_vm6, %v869_v46, 0.0 }
 0x3a6   : > { %562 = vadd.xlane.f32.xlu0 %v561_v47 }
 0x3a8   : > { %v871_v51 = vpop.eup %870 }
 0x3a9   : > { %v448_v52 = vsel %vm441_vm6, %v871_v51, 0.0 }
 0x3bc   : > { %568 = vrot.lane.b32.xlu0 %v1220_v7, %s1020_s14 }
 0x3db   : > { %449 = vadd.xlane.f32.xlu0 %v448_v52 }
 0x433   : > { %v563_v53 = vpop.xlane.xlu0 %562 }
 0x434   : > { %872 = vrcp.f32 %v563_v53 }
 0x437   : > { %v569_v54 = vpop.permute.xlu0 %568 }
 0x438   : > { %v574_v55 = vsel %vm457_vm3, %v569_v54, 0 }
 0x439   : > { %790 = vmatpush3.bf16.msra.mxu1 %v574_v55 }
 0x43e   : > { %v873_v56 = vpop.eup %872 }
 0x43f   : > { %v565_v57 = vmul.f32 %v873_v56, %v869_v46 }
 0x441   : > { %v566_v58 = vpack.c.bf16 %v565_v57, %v565_v57 }
 0x443   : > { %792 = vmatmul.mubr.msk.bf16.vlgmr.msra.gmra.mrb[4].mxu1 %vm441_vm6, %v566_v58 }
 0x468   : > { %v450_v59 = vpop.xlane.xlu0 %449 }
 0x469   : > { %874 = vrcp.f32 %v450_v59 }
 0x473   : > { %v875_v60 = vpop.eup %874 }
 0x474   : > { %v452_v61 = vmul.f32 %v875_v60, %v871_v51 }
 0x476   : > { %v453_v62 = vpack.c.bf16 %v452_v61, %v452_v61 }
 0x478   : > { %786 = vmatmul.mubr.msk.bf16.vlgmr.msra.gmra.mrb[4].mxu0 %vm441_vm6, %v453_v62 }
 0x516   : > { %v610_v63 = vpop.f32.mrb[4].mxu1 }
 0x517   : > { %v617_v0 = vmin.f32 %v610_v63, 0.0  ;;  %v793_v1 = vpop.f32.mrb[5].mxu1  ;;  %vm616_vm8 = vcmp.gt.f32.partialorder %v610_v63, 0.0 }
 0x518   : > { %v613_v2 = vpop.f32.mrb[6].mxu1 }
 0x519   : > { %v618_v3 = vmul.f32 1.442695, %v617_v0  ;;  %v794_v4 = vpop.f32.mrb[7].mxu1 }
 0x51b   : > { %876 = vpow2.f32 %v618_v3 }
 0x525   : > { %v877_v5 = vpop.eup %876 }
 0x526   : > { %v755_v6 = vadd.f32 -1.0, %v877_v5 }
 0x528   : > { %v621_v7 = vsel %vm616_vm8, %v610_v63, %v755_v6 }
 0x529   : > { %623 = vrot.lane.b32.xlu1 %v621_v7, %s1021_s26 }
 0x54b   : > { %v494_v8 = vpop.f32.mrb[4].mxu0 }
 0x54c   : > { %v787_v9 = vpop.f32.mrb[5].mxu0  ;;  %v501_v12 = vmin.f32 %v494_v8, 0.0  ;;  %vm500_vm9 = vcmp.gt.f32.partialorder %v494_v8, 0.0 }
 0x54d   : > { %v497_v10 = vpop.f32.mrb[6].mxu0 }
 0x54e   : > { %v788_v11 = vpop.f32.mrb[7].mxu0  ;;  %v502_v13 = vmul.f32 1.442695, %v501_v12 }
 0x550   : > { %878 = vpow2.f32 %v502_v13 }
 0x55a   : > { %v879_v14 = vpop.eup %878 }
 0x55b   : > { %v753_v15 = vadd.f32 -1.0, %v879_v14 }
 0x55d   : > { %v505_v16 = vsel %vm500_vm9, %v494_v8, %v753_v15 }
 0x59b   : > { %v624_v17 = vpop.permute.xlu1 %623 }
 0x59c   : > { %v626_v18 = vsel %vm286_vm1, %v505_v16, %v624_v17 }
 0x59d   : > { %627 = vst.msk [vmem:[%s267_s15] sm:$0xff] %vm347_vm2, %v626_v18 }
 0x59e   : > { %951 = shalt.err (!%p948_p9)
}
 0x59f   : > { %s952_s16 = scalar_lea.hbm %s1245_s11, 128  ;;  %s956_s17 = scalar_lea.hbm %s1296_s5, 256 }
 0x5a0   : > { %p953_p2 = scmp.ne.s32.totalorder %s1245_s11, %s952_s16  ;;  %p957_p1 = scmp.lt.u32.totalorder %s1245_s11, %s1296_s5 }
 0x5a1   : > { %p958_p11 = scmp.lt.u32.totalorder %s956_s17, %s952_s16  ;;  %p960_p6 = scmp.lt.u32.totalorder %s952_s16, %s1245_s11 }
 0x5a2   : > { %p954_p5 = pnand %p953_p2, %p1144_p12 }
 0x5a3   : > { %p959_p4 = por %p958_p11, %p957_p1 }
 0x5a4   : > { %p955_p0 = pneg %p954_p5 }
 0x5a5   : > { %p961_p8 = por %p960_p6, %p959_p4 }
 0x5a7   : > { %p962_p10 = pnand %p961_p8, %p955_p0 }
 0x5a9   : > { %965 = shalt.err (!%p962_p10)
}
 0x5aa   : > { %801 = dma.vmem_to_hbm [thread:$0]  (%p1144_p12), %s1247_s23, 128, %s1245_s11, %s629_s22  }
 0x5ab PF: > { %s654_s6 = sand.u32 1, %s996_s18   ;;  %p1311_p13 = scmp.ne.s32.totalorder %s1301_s25, 0 }
 0x5ac   : > { %p1312_p3 = scmp.ge.s32.totalorder %s1008_s21, 2  ;;  %s655_s15 = scalar_lea.sflag [#allocation4], %s654_s6 }
 0x5ae   : > { %p812_p7 = pnand %p1312_p3, %p1311_p13 }
 0x5b0   : > { %991 = dma.done.wait (!%p812_p7), %s655_s15, 128  }
 0x5b1   : > { %993 = vsyncadd (!%p812_p7), %s655_s15, 4294967168  ;;  %p19_p9 = scmp.ge.s32.totalorder %s1109_s30, 4   ;;  %s1313_s18 = smov %s1000_s19 }
 0x5b2   : > { %s1314_s19 = smov %s1004_s20  ;;  %s1315_s20 = smov %s1140_s8 }
 0x5b3   : > { %s1316_s21 = smov %s1109_s30  ;;  %21 = sbr.rel (!%p19_p9) target bundleno = 6 (0x6), region = 93 }
 0x5ba   :  { %660 = vsyncpa [#allocation3], 1 }
 0x5bb   :  { %662 = vsyncpa [#allocation3 + $0x1], 1 }
 0x5bc   :  { %663 = vsyncpa [#allocation6], 1 }
 0x5bd   :  { %665 = vsyncpa [#allocation6 + $0x1], 1 }
 0x5be   :  { %666 = vsyncpa [#allocation4], 1 }
 0x5bf   :  { %668 = vsyncpa [#allocation4 + $0x1], 1 }

</bundles_post_ra>
